<compile_context>
chip_gen: v5e
topology: v5e:2x2
jax: 0.10.0
libtpu: 0.0.40
codegen_flags: <defaults>
</compile_context>

<pallas_src>
import functools

import jax
import jax.numpy as jnp
from jax.experimental import pallas as pl
from jax.experimental.pallas import tpu as pltpu

_LANE = 128
_NEG_BIG = -1e30  # bias for padded class columns -> exp() == 0


def _round_up(x, m):
    return ((x + m - 1) // m) * m


def _cdiv(a, b):
    return -(-a // b)


def _mlp_softmax_kernel(x_ref, w1_ref, b1_ref, w2_ref, b2_ref, w3_ref, b3_ref,
                        o_ref, *, num_classes, bf16_exp):
    # bf16 MXU operands, f32 accumulation / elementwise.
    x = x_ref[...].astype(jnp.bfloat16)

    # Layer 1: Linear + ReLU   (Dropout(0.2) -> identity at inference)
    h1 = jnp.dot(x, w1_ref[...], preferred_element_type=jnp.float32)
    h1 = jnp.maximum(h1 + b1_ref[...], 0.0)

    # Layer 2: Linear + ReLU   (Dropout(0.2) -> identity at inference)
    h2 = jnp.dot(h1.astype(jnp.bfloat16), w2_ref[...],
                 preferred_element_type=jnp.float32)
    h2 = jnp.maximum(h2 + b2_ref[...], 0.0)

    # Layer 3: Linear + stable Softmax over the class axis.
    logits = jnp.dot(h2.astype(jnp.bfloat16), w3_ref[...],
                     preferred_element_type=jnp.float32)
    logits = logits + b3_ref[...]            # padded classes carry -1e30 bias

    m = jnp.max(logits, axis=1, keepdims=True)
    z = logits - m
    if bf16_exp:
        # bf16 EUP path (v6e / v7x) — halves the exp push per tile.
        e = jnp.exp(z.astype(jnp.bfloat16)).astype(jnp.float32)
    else:
        e = jnp.exp(z)
    denom = jnp.sum(e, axis=1, keepdims=True)
    inv = pl.reciprocal(denom, approx=True)  # EUP slot; frees VALU divide
    probs = e * inv

    # Store only the real class columns; o_ref last dim == num_classes, so
    # this is a masked store but ~13x fewer output bytes than the 128-lane
    # padded f32 slab (the kernel is HBM-bound).
    o_ref[...] = probs[:, :num_classes].astype(o_ref.dtype)


def _pad_and_cast_params(params):
    """Zero-pad hidden/class dims to 128 lanes; cast weights to bf16.

    Padding is exact: extra hidden units have zero weights/bias (ReLU(0)=0
    contributes nothing downstream); extra class columns get a -1e30 bias so
    their softmax weight is exactly 0.
    """
    w1, b1 = params["w1"], params["b1"]
    w2, b2 = params["w2"], params["b2"]
    w3, b3 = params["w3"], params["b3"]
    D, H = w1.shape
    C = w3.shape[1]
    HP = _round_up(H, _LANE)
    CP = _round_up(C, _LANE)

    bf = jnp.bfloat16
    w1p = jnp.zeros((D, HP), bf).at[:, :H].set(w1.astype(bf))
    b1p = jnp.zeros((1, HP), jnp.float32).at[:, :H].set(b1)
    w2p = jnp.zeros((HP, HP), bf).at[:H, :H].set(w2.astype(bf))
    b2p = jnp.zeros((1, HP), jnp.float32).at[:, :H].set(b2)
    w3p = jnp.zeros((HP, CP), bf).at[:H, :C].set(w3.astype(bf))
    b3p = jnp.full((1, CP), _NEG_BIG, jnp.float32).at[:, :C].set(b3)
    return w1p, b1p, w2p, b2p, w3p, b3p, C


def _pick_row_tile(B, block_rows):
    """Balanced row tile: minimize padding, amortize per-step overhead, and
    keep >= 2 grid steps (when B allows) so v7x megacore splits the batch."""
    n_steps = max(1, _cdiv(B, block_rows))
    if n_steps < 2 and B > 8:
        n_steps = 2
    TB = _round_up(_cdiv(B, n_steps), 8)
    PB = _round_up(B, TB)
    return TB, PB


def default_bf16_exp():
    """bf16 exp only on chips whose EUP has a bf16 path (v6e / v7x)."""
    try:
        kind = jax.devices()[0].device_kind.lower()
    except Exception:
        return False
    return ("v6" in kind) or ("v7" in kind)


@functools.partial(jax.jit, static_argnames=("block_rows", "bf16_exp"))
def failcode_classifier_forward(x, params, *, block_rows=1024, bf16_exp=False):
    """x: (B, input_size) float32. params: dict with w1,b1,w2,b2,w3,b3.

    Note: matmul operands are bf16 (f32 accumulation) and the softmax uses an
    approximate EUP reciprocal, so rows sum to 1 only within ~1e-3; this is
    an inference-oriented kernel.
    """
    B, D = x.shape
    w1p, b1p, w2p, b2p, w3p, b3p, C = _pad_and_cast_params(params)
    HP = w1p.shape[1]
    CP = w3p.shape[1]

    TB, PB = _pick_row_tile(B, block_rows)
    if PB != B:
        # Zero rows -> finite softmax rows that are simply dropped below.
        x = jnp.pad(x, ((0, PB - B), (0, 0)))

    resident = lambda shape: pl.BlockSpec(shape, lambda i: (0, 0))
    kernel = functools.partial(_mlp_softmax_kernel,
                               num_classes=C, bf16_exp=bf16_exp)

    out = pl.pallas_call(
        kernel,
        out_shape=jax.ShapeDtypeStruct((PB, C), jnp.float32),
        grid=(PB // TB,),
        in_specs=[
            pl.BlockSpec((TB, D), lambda i: (i, 0)),   # x: tiled over rows
            resident((D, HP)), resident((1, HP)),       # layer 1 (VMEM-resident)
            resident((HP, HP)), resident((1, HP)),      # layer 2
            resident((HP, CP)), resident((1, CP)),      # layer 3
        ],
        # Last dim == full array dim (num_classes): legal block, and avoids
        # writing a 128-lane padded slab.
        out_specs=pl.BlockSpec((TB, C), lambda i: (i, 0)),
        compiler_params=pltpu.CompilerParams(
            dimension_semantics=("parallel",)),          # megacore split on v7x
    )(x, w1p, b1p, w2p, b2p, w3p, b3p)

    # Only a cheap row-trim remains (nothing at all when PB == B).
    return out if PB == B else out[:B]


def init_params(key, input_size, hidden_size=64, num_classes=10):
    """Deterministic init mimicking PyTorch's default Linear init
    (uniform in [-1/sqrt(fan_in), 1/sqrt(fan_in)])."""
    ks = jax.random.split(key, 6)

    def lin(kw, kb, fan_in, fan_out):
        bound = 1.0 / jnp.sqrt(jnp.float32(fan_in))
        w = jax.random.uniform(kw, (fan_in, fan_out), jnp.float32, -bound, bound)
        b = jax.random.uniform(kb, (1, fan_out), jnp.float32, -bound, bound)
        return w, b

    w1, b1 = lin(ks[0], ks[1], input_size, hidden_size)
    w2, b2 = lin(ks[2], ks[3], hidden_size, hidden_size)
    w3, b3 = lin(ks[4], ks[5], hidden_size, num_classes)
    return {"w1": w1, "b1": b1, "w2": w2, "b2": b2, "w3": w3, "b3": b3}


if __name__ == "__main__":
    key = jax.random.PRNGKey(0)
    k_x, k_p = jax.random.split(key)

    batch = 20          # deliberately NOT a multiple of the row tile
    input_size = 32
    hidden_size = 64

    x = jax.random.normal(k_x, (batch, input_size), dtype=jnp.float32)
    params = init_params(k_p, input_size, hidden_size)

    use_bf16_exp = default_bf16_exp()

    # Small block_rows so the demo exercises a multi-step batch grid plus a
    # padded ragged last tile; production callers keep the default (1024).
    out_small = failcode_classifier_forward(
        x, params, block_rows=8, bf16_exp=use_bf16_exp)
    # Default tiling path (>=2 grid steps enforced for v7x megacore).
    out = failcode_classifier_forward(x, params, bf16_exp=use_bf16_exp)
    out = jax.block_until_ready(out)
    assert out.shape == (batch, 10)
    assert out_small.shape == (batch, 10)

    # Pure-JAX references: one matched to the kernel's bf16 matmul/exp path
    # (tight tolerance) and a full-f32 one (loose, accounts for bf16 operand
    # rounding + approx reciprocal).
    def ref_matched(x, p):
        bf, f32 = jnp.bfloat16, jnp.float32
        h1 = jnp.maximum(
            jnp.dot(x.astype(bf), p["w1"].astype(bf),
                    preferred_element_type=f32) + p["b1"], 0.0)
        h2 = jnp.maximum(
            jnp.dot(h1.astype(bf), p["w2"].astype(bf),
                    preferred_element_type=f32) + p["b2"], 0.0)
        logits = jnp.dot(h2.astype(bf), p["w3"].astype(bf),
                         preferred_element_type=f32) + p["b3"]
        m = jnp.max(logits, axis=1, keepdims=True)
        z = logits - m
        e = jnp.exp(z.astype(bf)).astype(f32) if use_bf16_exp else jnp.exp(z)
        return e / jnp.sum(e, axis=1, keepdims=True)

    def ref_f32(x, p):
        h1 = jnp.maximum(x @ p["w1"] + p["b1"], 0.0)
        h2 = jnp.maximum(h1 @ p["w2"] + p["b2"], 0.0)
        return jax.nn.softmax(h2 @ p["w3"] + p["b3"], axis=1)

    ref_m = ref_matched(x, params)
    assert jnp.allclose(out, ref_m, atol=5e-3)
    assert jnp.allclose(out_small, ref_m, atol=5e-3)
    assert jnp.allclose(out, ref_f32(x, params), atol=3e-2)
    assert jnp.allclose(jnp.sum(out, axis=1), jnp.ones((batch,)), atol=5e-3)
    assert jnp.allclose(out, out_small, atol=1e-6)

    print("KERNEL_OK")
</pallas_src>

<mosaic_0001>
module attributes {stable_mosaic.version = 11 : i64} {
  func.func @_mlp_softmax_kernel(%arg0: i32, %arg1: memref<8x32xf32, #tpu.memory_space<vmem>>, %arg2: memref<32x128xbf16, #tpu.memory_space<vmem>>, %arg3: memref<1x128xf32, #tpu.memory_space<vmem>>, %arg4: memref<128x128xbf16, #tpu.memory_space<vmem>>, %arg5: memref<1x128xf32, #tpu.memory_space<vmem>>, %arg6: memref<128x128xbf16, #tpu.memory_space<vmem>>, %arg7: memref<1x128xf32, #tpu.memory_space<vmem>>, %arg8: memref<8x10xf32, #tpu.memory_space<vmem>>) attributes {dimension_semantics = [#tpu.dimension_semantics<parallel>], iteration_bounds = array<i64: 3>, scalar_prefetch = 0 : i64, scratch_operands = 0 : i64, tpu.core_type = #tpu.core_type<tc>, window_params = [{transform_indices = @transform_0, window_bounds = array<i64: 8, 32>}, {pipeline_mode = #tpu.pipeline_mode<synchronous>, transform_indices = @transform_1, window_bounds = array<i64: 32, 128>}, {pipeline_mode = #tpu.pipeline_mode<synchronous>, transform_indices = @transform_2, window_bounds = array<i64: 1, 128>}, {pipeline_mode = #tpu.pipeline_mode<synchronous>, transform_indices = @transform_3, window_bounds = array<i64: 128, 128>}, {pipeline_mode = #tpu.pipeline_mode<synchronous>, transform_indices = @transform_4, window_bounds = array<i64: 1, 128>}, {pipeline_mode = #tpu.pipeline_mode<synchronous>, transform_indices = @transform_5, window_bounds = array<i64: 128, 128>}, {pipeline_mode = #tpu.pipeline_mode<synchronous>, transform_indices = @transform_6, window_bounds = array<i64: 1, 128>}, {transform_indices = @transform_7, window_bounds = array<i64: 8, 10>}]} {
    %c0 = arith.constant 0 : index
    %c0_0 = arith.constant 0 : index
    %0 = vector.load %arg1[%c0, %c0_0] : memref<8x32xf32, #tpu.memory_space<vmem>>, vector<8x32xf32>
    %1 = arith.truncf %0 : vector<8x32xf32> to vector<8x32xbf16>
    %c0_1 = arith.constant 0 : index
    %c0_2 = arith.constant 0 : index
    %2 = vector.load %arg2[%c0_1, %c0_2] : memref<32x128xbf16, #tpu.memory_space<vmem>>, vector<32x128xbf16>
    %cst = arith.constant dense<0.000000e+00> : vector<8x128xf32>
    %3 = tpu.matmul %1, %2, %cst {dimension_numbers = #tpu.dot_dimension_numbers<[1], [0], [0], [1], [0, 0, 1, 1], [], []>} : vector<8x32xbf16>, vector<32x128xbf16>, vector<8x128xf32> -> vector<8x128xf32>
    %c0_3 = arith.constant 0 : index
    %c0_4 = arith.constant 0 : index
    %4 = vector.load %arg3[%c0_3, %c0_4] : memref<1x128xf32, #tpu.memory_space<vmem>>, vector<1x128xf32>
    %5 = vector.broadcast %4 : vector<1x128xf32> to vector<8x128xf32>
    %6 = arith.addf %3, %5 : vector<8x128xf32>
    %cst_5 = arith.constant 0.000000e+00 : f32
    %7 = vector.broadcast %cst_5 : f32 to vector<8x128xf32>
    %8 = arith.maximumf %6, %7 : vector<8x128xf32>
    %9 = arith.truncf %8 : vector<8x128xf32> to vector<8x128xbf16>
    %c0_6 = arith.constant 0 : index
    %c0_7 = arith.constant 0 : index
    %10 = vector.load %arg4[%c0_6, %c0_7] : memref<128x128xbf16, #tpu.memory_space<vmem>>, vector<128x128xbf16>
    %cst_8 = arith.constant dense<0.000000e+00> : vector<8x128xf32>
    %11 = tpu.matmul %9, %10, %cst_8 {dimension_numbers = #tpu.dot_dimension_numbers<[1], [0], [0], [1], [0, 0, 1, 1], [], []>} : vector<8x128xbf16>, vector<128x128xbf16>, vector<8x128xf32> -> vector<8x128xf32>
    %c0_9 = arith.constant 0 : index
    %c0_10 = arith.constant 0 : index
    %12 = vector.load %arg5[%c0_9, %c0_10] : memref<1x128xf32, #tpu.memory_space<vmem>>, vector<1x128xf32>
    %13 = vector.broadcast %12 : vector<1x128xf32> to vector<8x128xf32>
    %14 = arith.addf %11, %13 : vector<8x128xf32>
    %cst_11 = arith.constant 0.000000e+00 : f32
    %15 = vector.broadcast %cst_11 : f32 to vector<8x128xf32>
    %16 = arith.maximumf %14, %15 : vector<8x128xf32>
    %17 = arith.truncf %16 : vector<8x128xf32> to vector<8x128xbf16>
    %c0_12 = arith.constant 0 : index
    %c0_13 = arith.constant 0 : index
    %18 = vector.load %arg6[%c0_12, %c0_13] : memref<128x128xbf16, #tpu.memory_space<vmem>>, vector<128x128xbf16>
    %cst_14 = arith.constant dense<0.000000e+00> : vector<8x128xf32>
    %19 = tpu.matmul %17, %18, %cst_14 {dimension_numbers = #tpu.dot_dimension_numbers<[1], [0], [0], [1], [0, 0, 1, 1], [], []>} : vector<8x128xbf16>, vector<128x128xbf16>, vector<8x128xf32> -> vector<8x128xf32>
    %c0_15 = arith.constant 0 : index
    %c0_16 = arith.constant 0 : index
    %20 = vector.load %arg7[%c0_15, %c0_16] : memref<1x128xf32, #tpu.memory_space<vmem>>, vector<1x128xf32>
    %21 = vector.broadcast %20 : vector<1x128xf32> to vector<8x128xf32>
    %22 = arith.addf %19, %21 : vector<8x128xf32>
    %cst_17 = arith.constant dense<0xFF800000> : vector<8xf32>
    %23 = vector.multi_reduction <maximumf>, %22, %cst_17 [1] : vector<8x128xf32> to vector<8xf32>
    %24 = vector.shape_cast %23 : vector<8xf32> to vector<8x1xf32>
    %25 = vector.broadcast %24 : vector<8x1xf32> to vector<8x128xf32>
    %26 = arith.subf %22, %25 : vector<8x128xf32>
    %27 = math.exp %26 : vector<8x128xf32>
    %cst_18 = arith.constant dense<0.000000e+00> : vector<8xf32>
    %28 = vector.multi_reduction <add>, %27, %cst_18 [1] : vector<8x128xf32> to vector<8xf32>
    %29 = vector.shape_cast %28 : vector<8xf32> to vector<8x1xf32>
    %30 = tpu.reciprocal %29 {approx = true} : vector<8x1xf32> -> vector<8x1xf32>
    %31 = vector.broadcast %30 : vector<8x1xf32> to vector<8x128xf32>
    %32 = arith.mulf %27, %31 : vector<8x128xf32>
    %33 = vector.extract_strided_slice %32 {offsets = [0, 0], sizes = [8, 10], strides = [1, 1]} : vector<8x128xf32> to vector<8x10xf32>
    %c0_19 = arith.constant 0 : index
    %c0_20 = arith.constant 0 : index
    %34 = vector.load %arg8[%c0_19, %c0_20] : memref<8x10xf32, #tpu.memory_space<vmem>>, vector<8x10xf32>
    tpu.vector_store %arg8[%c0_19, %c0_20], %33 {strides = array<i32>} : memref<8x10xf32, #tpu.memory_space<vmem>>, vector<8x10xf32>,
    return
  }
  func.func @transform_0(%arg0: i32) -> (i32, i32) {
    %c0_i32 = arith.constant 0 : i32
    %c0_i32_0 = arith.constant 0 : i32
    return %arg0, %c0_i32 : i32, i32
  }
  func.func @transform_1(%arg0: i32) -> (i32, i32) {
    %c0_i32 = arith.constant 0 : i32
    %c0_i32_0 = arith.constant 0 : i32
    %c0_i32_1 = arith.constant 0 : i32
    return %c0_i32, %c0_i32_0 : i32, i32
  }
  func.func @transform_2(%arg0: i32) -> (i32, i32) {
    %c0_i32 = arith.constant 0 : i32
    %c0_i32_0 = arith.constant 0 : i32
    %c0_i32_1 = arith.constant 0 : i32
    return %c0_i32, %c0_i32_0 : i32, i32
  }
  func.func @transform_3(%arg0: i32) -> (i32, i32) {
    %c0_i32 = arith.constant 0 : i32
    %c0_i32_0 = arith.constant 0 : i32
    %c0_i32_1 = arith.constant 0 : i32
    return %c0_i32, %c0_i32_0 : i32, i32
  }
  func.func @transform_4(%arg0: i32) -> (i32, i32) {
    %c0_i32 = arith.constant 0 : i32
    %c0_i32_0 = arith.constant 0 : i32
    %c0_i32_1 = arith.constant 0 : i32
    return %c0_i32, %c0_i32_0 : i32, i32
  }
  func.func @transform_5(%arg0: i32) -> (i32, i32) {
    %c0_i32 = arith.constant 0 : i32
    %c0_i32_0 = arith.constant 0 : i32
    %c0_i32_1 = arith.constant 0 : i32
    return %c0_i32, %c0_i32_0 : i32, i32
  }
  func.func @transform_6(%arg0: i32) -> (i32, i32) {
    %c0_i32 = arith.constant 0 : i32
    %c0_i32_0 = arith.constant 0 : i32
    %c0_i32_1 = arith.constant 0 : i32
    return %c0_i32, %c0_i32_0 : i32, i32
  }
  func.func @transform_7(%arg0: i32) -> (i32, i32) {
    %c0_i32 = arith.constant 0 : i32
    %c0_i32_0 = arith.constant 0 : i32
    return %arg0, %c0_i32 : i32, i32
  }
}

</mosaic_0001>

<bundles_post_ra>
// kernel: failcode_classifier_forward.1
= control target key start
LH: loop header
LB: loop body
LE: loop exit
PB: predicated region body
PF: predicated region fallthrough
CT: control target
= control target key end

     0   :  { %s707_s24 = smov 0   ;;  %s794_s0 = inlined_call_operand.vmem [shape: f32[24,32], index: 0, kind: input, shape index: {}]   ;;  %s795_s1 = inlined_call_operand.vmem [shape: bf16[32,128], index: 1, kind: input, shape index: {}]   ;;  %s796_s2 = inlined_call_operand.vmem [shape: f32[1,128], index: 2, kind: input, shape index: {}]   ;;  %s797_s3 = inlined_call_operand.vmem [shape: bf16[128,128], index: 3, kind: input, shape index: {}]   ;;  %s798_s4 = inlined_call_operand.vmem [shape: f32[1,128], index: 4, kind: input, shape index: {}]   ;;  %s799_s5 = inlined_call_operand.vmem [shape: bf16[128,128], index: 5, kind: input, shape index: {}]   ;;  %s800_s6 = inlined_call_operand.vmem [shape: f32[1,128], index: 6, kind: input, shape index: {}]   ;;  %s801_s7 = inlined_call_operand.vmem [shape: f32[24,10], index: 7, kind: output, shape index: {}]  }
   0x1 LB: > { %s544_s25 = sadd.s32 4294967295, %s665_s24   ;;  %p548_p0 = scmp.ge.s32.totalorder %s665_s24, 1  ;;  %s665_s24 = sphi %s707_s24, %s17_s24  }
   0x2   : > { %p236_p1 = scmp.lt.s32.totalorder %s665_s24, 4 }
   0x4   : > { %p237_p2 = pnand %p548_p0, %p236_p1 }
   0x5   : > { %p266_p3 = scmp.lt.s32.totalorder (!%p237_p2), %s544_s25, 2 }
   0x6   : > { %240 = sbr.rel (%p237_p2) target bundleno = 670 (0x29e), region = 48 }
   0xb   : > { %v627_v0 = vld [vmem:[%s795_s1 + $0x8] sm:$0xff]  ;;  %v635_v1 = vld [vmem:[%s797_s3 + $0x38] sm:$0xff]  ;;  %v626_v2 = vld [vmem:[%s795_s1] sm:$0xff]  ;;  %s803_s25 = smov (!%p266_p3, %s544_s25), 2  ;;  %vm297_vm0 = vcmask 261120   ;;  %vm489_vm1 = vcmask 80896  }
   0xc   : > { %307 = vmatpush.bf16.msra.mxu0 %v627_v0  ;;  %384 = vmatpush.bf16.msra.mxu1 %v635_v1  ;;  %v634_v3 = vld [vmem:[%s797_s3 + $0x30] sm:$0xff]  ;;  %s549_s11 = sshll.u32 %s803_s25, 3  ;;  %v633_v5 = vld [vmem:[%s797_s3 + $0x28] sm:$0xff]  ;;  %v632_v7 = vld [vmem:[%s797_s3 + $0x20] sm:$0xff] }
   0xd   : > { %s269_s14 = scalar_lea.vmem %s794_s0, %s549_s11  ;;  %v631_v8 = vld [vmem:[%s797_s3 + $0x18] sm:$0xff]  ;;  %v630_v9 = vld [vmem:[%s797_s3 + $0x10] sm:$0xff]  ;;  %v629_v10 = vld [vmem:[%s797_s3 + $0x8] sm:$0xff]  ;;  %s273_s10 = scalar_lea.vmem %s801_s7, %s549_s11 }
   0xe   : > { %v275_v4 = vld [vmem:[%s269_s14] sm:$0xff]  ;;  %v643_v12 = vld [vmem:[%s799_s5 + $0x38] sm:$0xff]  ;;  %v642_v13 = vld [vmem:[%s799_s5 + $0x30] sm:$0xff] }
   0xf   : > { %v276_v6 = vpack.c.bf16 %v275_v4, %v275_v4  ;;  %v628_v11 = vld [vmem:[%s797_s3] sm:$0xff]  ;;  %467 = vmatpush.bf16.msra.mxu2 %v643_v12  ;;  %v641_v14 = vld [vmem:[%s799_s5 + $0x28] sm:$0xff]  ;;  %v639_v16 = vld [vmem:[%s799_s5 + $0x18] sm:$0xff] }
  0x10   : > { %308 = vmatpush.bf16.msra.mxu0 %v626_v2  ;;  %385 = vmatpush.bf16.msra.mxu1 %v634_v3  ;;  %v640_v15 = vld [vmem:[%s799_s5 + $0x20] sm:$0xff]  ;;  %v638_v17 = vld [vmem:[%s799_s5 + $0x10] sm:$0xff]  ;;  %v637_v24 = vld [vmem:[%s799_s5 + $0x8] sm:$0xff] }
  0x11   : > { %v652_v18 = vld [vmem:[%s796_s2] ss:$0 sm:$0xff] }
  0x12   : > { %v636_v25 = vld [vmem:[%s799_s5] sm:$0xff] }
  0x13   : > { %559 = vmatmul.msk.bf16.vlgmr.msra.gmra.mxu0 %vm297_vm0, %v276_v6  ;;  %468 = vmatpush.bf16.msra.mxu2 %v642_v13  ;;  %v653_v26 = vld [vmem:[%s798_s4] ss:$0 sm:$0xff] }
  0x14   : > { %386 = vmatpush.bf16.msra.mxu1 %v633_v5  ;;  %v654_v32 = vld [vmem:[%s800_s6] ss:$0 sm:$0xff] }
  0x17   : > { %469 = vmatpush.bf16.msra.mxu2 %v641_v14 }
  0x18   : > { %387 = vmatpush.bf16.msra.mxu1 %v632_v7 }
  0x1b   : > { %470 = vmatpush.bf16.msra.mxu2 %v640_v15 }
  0x1c   : > { %388 = vmatpush.bf16.msra.mxu1 %v631_v8 }
  0x1f   : > { %471 = vmatpush.bf16.msra.mxu2 %v639_v16 }
  0x20   : > { %389 = vmatpush.bf16.msra.mxu1 %v630_v9 }
  0x23   : > { %472 = vmatpush.bf16.msra.mxu2 %v638_v17 }
  0x24   : > { %390 = vmatpush.bf16.msra.mxu1 %v629_v10 }
  0x27   : > { %473 = vmatpush.bf16.msra.mxu2 %v637_v24 }
  0x28   : > { %391 = vmatpush.bf16.msra.mxu1 %v628_v11 }
  0x2b   : > { %474 = vmatpush.bf16.msra.mxu2 %v636_v25 }
  0x90   : > { %v310_v19 = vpop.f32.mrf.mxu0 }
  0x91   : > { %v311_v20 = vadd.f32 %v652_v18, %v310_v19 }
  0x93   : > { %v314_v21 = vmax.f32 %v311_v20, 0.0 }
  0x95   : > { %v315_v22 = vpack.c.bf16 %v314_v21, %v314_v21 }
  0x97   : > { %392 = vmatmul.bf16.vlgmr.msra.gmra.mxu1 %v315_v22 }
  0x98   : > { %v312_v23 = vpop.f32.mrf.mxu0 }
 0x114   : > { %v393_v27 = vpop.f32.mrf.mxu1 }
 0x115   : > { %v394_v28 = vadd.f32 %v653_v26, %v393_v27 }
 0x117   : > { %v397_v29 = vmax.f32 %v394_v28, 0.0 }
 0x119   : > { %v398_v30 = vpack.c.bf16 %v397_v29, %v397_v29 }
 0x11b   : > { %475 = vmatmul.bf16.vlgmr.msra.gmra.mxu2 %v398_v30 }
 0x11c   : > { %v395_v31 = vpop.f32.mrf.mxu1 }
 0x19e   : > { %v476_v33 = vpop.f32.mrf.mxu2 }
 0x19f   : > { %v477_v34 = vadd.f32 %v654_v32, %v476_v33 }
 0x1a1   : > { %480 = vmax.xlane.f32.xlu0 %v477_v34 }
 0x1a6   : > { %v478_v35 = vpop.f32.mrf.mxu2 }
 0x214   : > { %v481_v36 = vpop.xlane.xlu0 %480 }
 0x215   : > { %v482_v37 = vsub.f32 %v477_v34, %v481_v36 }
 0x217   : > { %v483_v38 = vmul.f32 1.442695, %v482_v37 }
 0x219   : > { %655 = vpow2.f32 %v483_v38 }
 0x21f   : > { %v656_v39 = vpop.eup %655 }
 0x220   : > { %485 = vadd.xlane.f32.xlu0 %v656_v39 }
 0x293   : > { %v486_v40 = vpop.xlane.xlu0 %485 }
 0x294   : > { %657 = vrcp.f32 %v486_v40 }
 0x29a   : > { %v658_v41 = vpop.eup %657 }
 0x29b   : > { %v488_v42 = vmul.f32 %v658_v41, %v656_v39 }
 0x29d   : > { %490 = vst.msk [vmem:[%s273_s10] sm:$0xff] %vm489_vm1, %v488_v42 }
 0x29e PF: > { %s17_s24 = sadd.s32 1, %s665_s24  }
 0x29f   : > { %p14_p4 = scmp.ge.s32.totalorder %s17_s24, 5  }
 0x2a1   :  { %16 = sbr.rel (!%p14_p4) target bundleno = 1 (0x1), region = 78 }

</bundles_post_ra>
